<compile_context>
chip_gen: v7x
topology: tpu7x:2x2x1
jax: 0.10.0
libtpu: 0.0.40
codegen_flags: <defaults>
</compile_context>

<pallas_src>
import math

import jax
import jax.numpy as jnp
from jax.experimental import pallas as pl
from jax.experimental.pallas import tpu as pltpu

_LANE = 128


def _vmem_capacity_bytes():
    """Physical VMEM per TensorCore; conservative (v7x) fallback if the query fails."""
    try:
        return int(pltpu.get_tpu_info().vmem_capacity_bytes)
    except Exception:
        return 64 * 1024 * 1024


def _vmem_budgets():
    cap = _vmem_capacity_bytes()
    if cap >= 100 * 1024 * 1024:              # v5e / v6e: 128 MiB physical VMEM
        return 48 * 1024 * 1024, 96 * 1024 * 1024
    # v7x: 64 MiB per TensorCore -> keep double buffers comfortably resident
    return 20 * 1024 * 1024, 40 * 1024 * 1024


def _pick_tile_cols(total_cols, sc_rows, itemsize, io_budget, min_col_steps):
    """Largest 128-multiple column tile dividing total_cols that fits the IO budget.

    total_cols is already padded to a multiple of 128 on the host, so 128 always
    divides: no masked-store / giant-single-block fallback exists.
    """
    assert total_cols % _LANE == 0
    per_col = 4 * sc_rows * itemsize          # (x tile + out tile) * double-buffered
    cap = max(_LANE, (io_budget // per_col) // _LANE * _LANE)
    # guarantee at least `min_col_steps` steps along the column axis (v7x megacore)
    cap = min(cap, max(_LANE, (total_cols // max(min_col_steps, 1)) // _LANE * _LANE))
    cap = min(cap, total_cols)
    t = cap
    while t > _LANE and total_cols % t != 0:
        t -= _LANE
    return t


def _frames_per_store(snip_size, C, row_align):
    """Smallest number of frames whose fused row count is sublane-tile aligned."""
    f = row_align // math.gcd(C, row_align)
    if f > snip_size or snip_size % f != 0:
        return snip_size
    return f


def _make_kernel(snip_size, C, frames_per_store):
    SC = snip_size * C
    FC = frames_per_store * C

    def kernel(x_ref, wt_ref, bt_ref, wg_ref, bg_ref, out_ref):
        # temporal conv (kernel (S,1)) with the BN affine pre-folded, then ReLU.
        # x_ref (bf16) feeds the MXU directly; accumulate in f32.
        t = jnp.dot(wt_ref[...], x_ref[...],
                    preferred_element_type=jnp.float32) + bt_ref[...]      # (C, thw)
        y = jnp.maximum(t, 0.0)
        # global 1x1 conv (tiny C x C f32 matmul, f32 weights for precision)
        g = jnp.dot(wg_ref[...], y, preferred_element_type=jnp.float32) + bg_ref[...]
        # residual: out[s*C + c, :] = x[s*C + c, :] + g[c, :], stored in
        # sublane-aligned row groups -- no (SC, thw) f32 broadcast temporary.
        g_rep = jnp.tile(g, (frames_per_store, 1)) if frames_per_store > 1 else g
        for s0 in range(0, snip_size, frames_per_store):
            rows = pl.ds(s0 * C, FC)
            out_ref[rows, :] = (x_ref[rows, :].astype(jnp.float32)
                                + g_rep).astype(out_ref.dtype)

    return kernel


def temporal_context_block_short(x, wt, bt, bn_scale, bn_shift, wg, bg, *,
                                 snip_size, io_dtype=jnp.bfloat16):
    """Pallas forward of TemporalContextBlockshort.

    x        : (B*snip_size, C, H, W) input (I/O runs in `io_dtype`, math in f32)
    wt, bt   : temporal_conv weight (C, C, snip_size) / bias (C,)
    bn_*     : BatchNorm2d(C) eval-mode per-channel affine (scale, shift)
    wg, bg   : global_conv weight (C, C) / bias (C,)
    returns  : (B*snip_size, C, H, W) in `io_dtype`
    """
    B_S, C, H, W = x.shape
    S = snip_size
    assert B_S % S == 0
    B, HW, SC = B_S // S, H * W, S * C
    item = jnp.dtype(io_dtype).itemsize

    # ---- host-side folding (BN affine into the temporal conv) ----
    # wt_flat[o, s*C + i] == wt[o, i, s]  (matches the free-reshape row order s*C + i)
    wt_flat = jnp.transpose(wt, (0, 2, 1)).reshape(C, SC)
    wt_fold = (bn_scale[:, None] * wt_flat).astype(io_dtype)        # bf16 MXU operand
    bt_fold = (bn_scale * bt + bn_shift).reshape(C, 1).astype(jnp.float32)
    wg_f32 = wg.astype(jnp.float32)
    bg_col = bg.reshape(C, 1).astype(jnp.float32)

    # ---- FREE layout: (B*S, C, H, W) -> (B, S*C, HW); pad columns to a lane multiple
    x_slab = x.reshape(B, SC, HW).astype(io_dtype)
    HW_pad = pl.cdiv(HW, _LANE) * _LANE
    if HW_pad != HW:
        x_slab = jnp.pad(x_slab, ((0, 0), (0, 0), (0, HW_pad - HW)))

    # ---- generation-aware tiling ----
    io_budget, vmem_limit = _vmem_budgets()
    min_col_steps = 1 if B >= 2 else 2        # keep both v7x TensorCores busy
    thw = _pick_tile_cols(HW_pad, SC, item, io_budget, min_col_steps)
    grid = (B, HW_pad // thw)

    row_align = 16 if item == 2 else 8
    kernel = _make_kernel(S, C, _frames_per_store(S, C, row_align))

    bytes_accessed = (2 * B * SC * HW_pad * item            # x read + out write
                      + SC * C * item + (C * C + 2 * C) * 4)
    flops = 2 * (SC + C) * C * B * HW_pad + 3 * SC * B * HW_pad

    out_slab = pl.pallas_call(
        kernel,
        out_shape=jax.ShapeDtypeStruct((B, SC, HW_pad), io_dtype),
        grid_spec=pltpu.PrefetchScalarGridSpec(
            num_scalar_prefetch=0,
            grid=grid,
            in_specs=[
                pl.BlockSpec((None, SC, thw), lambda b, j: (b, 0, j)),  # x column tile
                pl.BlockSpec((C, SC), lambda b, j: (0, 0)),   # folded temporal weight
                pl.BlockSpec((C, 1), lambda b, j: (0, 0)),    # folded temporal bias
                pl.BlockSpec((C, C), lambda b, j: (0, 0)),    # global 1x1 weight
                pl.BlockSpec((C, 1), lambda b, j: (0, 0)),    # global bias
            ],
            out_specs=pl.BlockSpec((None, SC, thw), lambda b, j: (b, 0, j)),
        ),
        compiler_params=pltpu.CompilerParams(
            dimension_semantics=("parallel", "parallel"),
            vmem_limit_bytes=vmem_limit,
        ),
        cost_estimate=pl.CostEstimate(
            flops=flops, transcendentals=0, bytes_accessed=bytes_accessed),
    )(x_slab, wt_fold, bt_fold, wg_f32, bg_col)

    if HW_pad != HW:
        out_slab = out_slab[:, :, :HW]
    return out_slab.reshape(B_S, C, H, W)                    # free reshape back


if __name__ == "__main__":
    # Small deterministic problem: 2 snippet-groups of 4 frames, 8 channels, 16x16.
    B, S, C, H, W = 2, 4, 8, 16, 16
    B_S, HW = B * S, H * W

    key = jax.random.PRNGKey(0)
    k = jax.random.split(key, 8)

    x = jax.random.normal(k[0], (B_S, C, H, W), jnp.float32)      # PyTorch NCHW input

    # temporal_conv: Conv2d(C, C, (S, 1)) -> weight (C, C, S), bias (C,)
    fan_in = C * S
    wt = jax.random.normal(k[1], (C, C, S), jnp.float32) * (2.0 / fan_in) ** 0.5
    bt = 0.01 * jax.random.normal(k[2], (C,), jnp.float32)

    # temporal_norm: BatchNorm2d(C) eval mode -> per-channel affine (deterministic)
    gamma = 1.0 + 0.1 * jax.random.normal(k[3], (C,), jnp.float32)
    beta = 0.1 * jax.random.normal(k[4], (C,), jnp.float32)
    run_mean = 0.1 * jax.random.normal(k[5], (C,), jnp.float32)
    run_var = jnp.abs(1.0 + 0.1 * jax.random.normal(k[6], (C,), jnp.float32))
    eps = 1e-5
    scale = gamma / jnp.sqrt(run_var + eps)
    shift = beta - run_mean * scale

    # global_conv: Conv2d(C, C, 1) -> weight (C, C), bias (C,)
    # (the module zero-inits this; nonzero here so the kernel path is non-trivial)
    wg = 0.1 * jax.random.normal(k[7], (C, C), jnp.float32)
    bg = jnp.zeros((C,), jnp.float32)

    out = temporal_context_block_short(x, wt, bt, scale, shift, wg, bg, snip_size=S)
    out = jax.block_until_ready(out)

    # Pure-JAX f32 reference of the PyTorch forward (un-folded path; correctness gate).
    x5 = x.reshape(B, S, C, HW)
    xp = jnp.transpose(x5, (0, 2, 1, 3))                               # (B, C, S, HW)
    t_ref = jnp.einsum('ois,bisp->bop', wt, xp) + bt[None, :, None]    # temporal conv
    y_ref = jnp.maximum(t_ref * scale[None, :, None] + shift[None, :, None], 0.0)
    g_ref = jnp.einsum('oi,bip->bop', wg, y_ref) + bg[None, :, None]   # global 1x1 conv
    ref = (x5 + g_ref[:, None, :, :]).reshape(B_S, C, H, W)

    # bf16 I/O + bf16 temporal weights -> loosened tolerance vs the pure-f32 reference
    # (an indexing/layout bug would produce O(1) errors, so this still gates structure).
    err = float(jnp.max(jnp.abs(out.astype(jnp.float32) - ref)))
    assert err < 8e-2, err
    print("KERNEL_OK")
</pallas_src>

<mosaic_0001>
module attributes {stable_mosaic.version = 11 : i64} {
  func.func @kernel(%arg0: i32, %arg1: i32, %arg2: memref<1x32x256xbf16, #tpu.memory_space<vmem>>, %arg3: memref<8x32xbf16, #tpu.memory_space<vmem>>, %arg4: memref<8x1xf32, #tpu.memory_space<vmem>>, %arg5: memref<8x8xf32, #tpu.memory_space<vmem>>, %arg6: memref<8x1xf32, #tpu.memory_space<vmem>>, %arg7: memref<1x32x256xbf16, #tpu.memory_space<vmem>>) attributes {dimension_semantics = [#tpu.dimension_semantics<parallel>, #tpu.dimension_semantics<parallel>], iteration_bounds = array<i64: 2, 1>, scalar_prefetch = 0 : i64, scratch_operands = 0 : i64, tpu.core_type = #tpu.core_type<tc>, window_params = [{transform_indices = @transform_0, window_bounds = array<i64: 1, 32, 256>}, {pipeline_mode = #tpu.pipeline_mode<synchronous>, transform_indices = @transform_1, window_bounds = array<i64: 8, 32>}, {pipeline_mode = #tpu.pipeline_mode<synchronous>, transform_indices = @transform_2, window_bounds = array<i64: 8, 1>}, {pipeline_mode = #tpu.pipeline_mode<synchronous>, transform_indices = @transform_3, window_bounds = array<i64: 8, 8>}, {pipeline_mode = #tpu.pipeline_mode<synchronous>, transform_indices = @transform_4, window_bounds = array<i64: 8, 1>}, {transform_indices = @transform_5, window_bounds = array<i64: 1, 32, 256>}]} {
    %c0 = arith.constant 0 : index
    %c0_0 = arith.constant 0 : index
    %0 = vector.load %arg3[%c0, %c0_0] : memref<8x32xbf16, #tpu.memory_space<vmem>>, vector<8x32xbf16>
    %c0_1 = arith.constant 0 : index
    %c0_2 = arith.constant 0 : index
    %c0_3 = arith.constant 0 : index
    %1 = vector.load %arg2[%c0_1, %c0_2, %c0_3] : memref<1x32x256xbf16, #tpu.memory_space<vmem>>, vector<1x32x256xbf16>
    %2 = vector.shape_cast %1 : vector<1x32x256xbf16> to vector<32x256xbf16>
    %cst = arith.constant dense<0.000000e+00> : vector<8x256xf32>
    %3 = tpu.matmul %0, %2, %cst {dimension_numbers = #tpu.dot_dimension_numbers<[1], [0], [0], [1], [0, 0, 1, 1], [], []>} : vector<8x32xbf16>, vector<32x256xbf16>, vector<8x256xf32> -> vector<8x256xf32>
    %c0_4 = arith.constant 0 : index
    %c0_5 = arith.constant 0 : index
    %4 = vector.load %arg4[%c0_4, %c0_5] : memref<8x1xf32, #tpu.memory_space<vmem>>, vector<8x1xf32>
    %5 = vector.broadcast %4 : vector<8x1xf32> to vector<8x256xf32>
    %6 = arith.addf %3, %5 : vector<8x256xf32>
    %cst_6 = arith.constant 0.000000e+00 : f32
    %7 = vector.broadcast %cst_6 : f32 to vector<8x256xf32>
    %8 = arith.maximumf %6, %7 : vector<8x256xf32>
    %c0_7 = arith.constant 0 : index
    %c0_8 = arith.constant 0 : index
    %9 = vector.load %arg5[%c0_7, %c0_8] : memref<8x8xf32, #tpu.memory_space<vmem>>, vector<8x8xf32>
    %cst_9 = arith.constant dense<0.000000e+00> : vector<8x256xf32>
    %10 = tpu.matmul %9, %8, %cst_9 {dimension_numbers = #tpu.dot_dimension_numbers<[1], [0], [0], [1], [0, 0, 1, 1], [], []>} : vector<8x8xf32>, vector<8x256xf32>, vector<8x256xf32> -> vector<8x256xf32>
    %c0_10 = arith.constant 0 : index
    %c0_11 = arith.constant 0 : index
    %11 = vector.load %arg6[%c0_10, %c0_11] : memref<8x1xf32, #tpu.memory_space<vmem>>, vector<8x1xf32>
    %12 = vector.broadcast %11 : vector<8x1xf32> to vector<8x256xf32>
    %13 = arith.addf %10, %12 : vector<8x256xf32>
    %14 = tpu.concatenate %13, %13 in 0 : vector<8x256xf32>, vector<8x256xf32> -> vector<16x256xf32>
    %c0_12 = arith.constant 0 : index
    %c0_13 = arith.constant 0 : index
    %c0_14 = arith.constant 0 : index
    %15 = vector.load %arg2[%c0_12, %c0_13, %c0_14] : memref<1x32x256xbf16, #tpu.memory_space<vmem>>, vector<1x16x256xbf16>
    %16 = vector.shape_cast %15 : vector<1x16x256xbf16> to vector<16x256xbf16>
    %17 = arith.extf %16 : vector<16x256xbf16> to vector<16x256xf32>
    %18 = arith.addf %17, %14 : vector<16x256xf32>
    %19 = arith.truncf %18 : vector<16x256xf32> to vector<16x256xbf16>
    %c0_15 = arith.constant 0 : index
    %c0_16 = arith.constant 0 : index
    %c0_17 = arith.constant 0 : index
    %20 = vector.load %arg7[%c0_15, %c0_16, %c0_17] : memref<1x32x256xbf16, #tpu.memory_space<vmem>>, vector<1x16x256xbf16>
    %21 = vector.shape_cast %20 : vector<1x16x256xbf16> to vector<16x256xbf16>
    %22 = vector.shape_cast %19 : vector<16x256xbf16> to vector<1x16x256xbf16>
    tpu.vector_store %arg7[%c0_15, %c0_16, %c0_17], %22 {strides = array<i32>} : memref<1x32x256xbf16, #tpu.memory_space<vmem>>, vector<1x16x256xbf16>,
    %c0_18 = arith.constant 0 : index
    %c16 = arith.constant 16 : index
    %c0_19 = arith.constant 0 : index
    %23 = vector.load %arg2[%c0_18, %c16, %c0_19] : memref<1x32x256xbf16, #tpu.memory_space<vmem>>, vector<1x16x256xbf16>
    %24 = vector.shape_cast %23 : vector<1x16x256xbf16> to vector<16x256xbf16>
    %25 = arith.extf %24 : vector<16x256xbf16> to vector<16x256xf32>
    %26 = arith.addf %25, %14 : vector<16x256xf32>
    %27 = arith.truncf %26 : vector<16x256xf32> to vector<16x256xbf16>
    %c0_20 = arith.constant 0 : index
    %c16_21 = arith.constant 16 : index
    %c0_22 = arith.constant 0 : index
    %28 = vector.load %arg7[%c0_20, %c16_21, %c0_22] : memref<1x32x256xbf16, #tpu.memory_space<vmem>>, vector<1x16x256xbf16>
    %29 = vector.shape_cast %28 : vector<1x16x256xbf16> to vector<16x256xbf16>
    %30 = vector.shape_cast %27 : vector<16x256xbf16> to vector<1x16x256xbf16>
    tpu.vector_store %arg7[%c0_20, %c16_21, %c0_22], %30 {strides = array<i32>} : memref<1x32x256xbf16, #tpu.memory_space<vmem>>, vector<1x16x256xbf16>,
    return
  }
  func.func @transform_0(%arg0: i32, %arg1: i32) -> (i32, i32, i32) {
    %c0_i32 = arith.constant 0 : i32
    %c0_i32_0 = arith.constant 0 : i32
    return %arg0, %c0_i32, %arg1 : i32, i32, i32
  }
  func.func @transform_1(%arg0: i32, %arg1: i32) -> (i32, i32) {
    %c0_i32 = arith.constant 0 : i32
    %c0_i32_0 = arith.constant 0 : i32
    %c0_i32_1 = arith.constant 0 : i32
    return %c0_i32, %c0_i32_0 : i32, i32
  }
  func.func @transform_2(%arg0: i32, %arg1: i32) -> (i32, i32) {
    %c0_i32 = arith.constant 0 : i32
    %c0_i32_0 = arith.constant 0 : i32
    %c0_i32_1 = arith.constant 0 : i32
    return %c0_i32, %c0_i32_0 : i32, i32
  }
  func.func @transform_3(%arg0: i32, %arg1: i32) -> (i32, i32) {
    %c0_i32 = arith.constant 0 : i32
    %c0_i32_0 = arith.constant 0 : i32
    %c0_i32_1 = arith.constant 0 : i32
    return %c0_i32, %c0_i32_0 : i32, i32
  }
  func.func @transform_4(%arg0: i32, %arg1: i32) -> (i32, i32) {
    %c0_i32 = arith.constant 0 : i32
    %c0_i32_0 = arith.constant 0 : i32
    %c0_i32_1 = arith.constant 0 : i32
    return %c0_i32, %c0_i32_0 : i32, i32
  }
  func.func @transform_5(%arg0: i32, %arg1: i32) -> (i32, i32, i32) {
    %c0_i32 = arith.constant 0 : i32
    %c0_i32_0 = arith.constant 0 : i32
    return %arg0, %c0_i32, %arg1 : i32, i32, i32
  }
}

</mosaic_0001>

<bundles_post_ra>
// kernel: tpu_custom_call.1
= control target key start
LH: loop header
LB: loop body
LE: loop exit
PB: predicated region body
PF: predicated region fallthrough
CT: control target
= control target key end

     0   :  { %10 = vsyncpa [#allocation3], 0  ;;  %s1022_s0 = inlined_call_operand.hbm [shape: bf16[2,32,256], index: 0, kind: input, shape index: {}]   ;;  %s1023_s1 = inlined_call_operand.vmem [shape: bf16[8,32], index: 1, kind: input, shape index: {}]   ;;  %s1024_s2 = inlined_call_operand.vmem [shape: f32[8,1], index: 2, kind: input, shape index: {}]   ;;  %s1025_s3 = inlined_call_operand.vmem [shape: f32[8,8], index: 3, kind: input, shape index: {}]   ;;  %s1026_s4 = inlined_call_operand.vmem [shape: f32[8,1], index: 4, kind: input, shape index: {}]   ;;  %s1027_s5 = inlined_call_operand.hbm [shape: bf16[2,32,256], index: 5, kind: output, shape index: {}]  }
   0x1   :  { %12 = vsyncpa [#allocation3 + $0x1], 0 }
   0x2   :  { %13 = vsyncpa [#allocation4], 0 }
   0x3   :  { %15 = vsyncpa [#allocation4 + $0x1], 0  ;;  %s831_s18 = smov 0   ;;  %s833_s19 = smov 0  }
   0x4   :  { %s835_s20 = smov 0   ;;  %s837_s21 = smov 0  }
   0x5   :  { %s839_s22 = smov 0   ;;  %s841_s23 = smov 0  }
   0x6 LB: > { %s575_s24 = sadd.s32 4294967295, %s791_s23   ;;  %s576_s25 = sadd.s32 4294967294, %s791_s23   ;;  %s791_s23 = sphi %s841_s23, %s21_s23   ;;  %s787_s22 = sphi %s839_s22, %s1042_s22   ;;  %s783_s21 = sphi %s837_s21, %s1041_s21   ;;  %s779_s20 = sphi %s835_s20, %s1040_s20   ;;  %s775_s19 = sphi %s833_s19, %s1039_s19   ;;  %s771_s18 = sphi %s831_s18, %s1038_s18  }
   0x7   : > { %s33_s26 = sadd.s32 1, %s787_s22  ;;  %s42_s27 = sadd.s32 1, %s779_s20 }
   0x8   : > { %p35_p0 = scmp.ge.s32.totalorder %s33_s26, 2  ;;  %p49_p1 = scmp.ne.s32.totalorder %s779_s20, %s775_s19 }
   0x9   : > { %p50_p2 = scmp.eq.s32.totalorder %s791_s23, 0  ;;  %p55_p3 = scmp.ne.s32.totalorder %s775_s19, %s771_s18 }
   0xa   : > { %s1044_s26 = smov (%p35_p0, %s33_s26), 0  ;;  %p56_p5 = scmp.eq.s32.totalorder %s575_s24, 0 }
   0xb   : > { %p872_p4 = por %p50_p2, %p49_p1  ;;  %s37_s29 = ssub.s32 %s787_s22, %s1044_s26 }
   0xc   : > { %p165_p6 = scmp.eq.s32.totalorder %s575_s24, 1  ;;  %p40_p7 = scmp.eq.s32.totalorder %s37_s29, 0 }
   0xd   : > { %p878_p8 = por %p56_p5, %p55_p3  ;;  %p171_p10 = scmp.eq.s32.totalorder %s576_s25, 1 }
   0xe   : > { %p882_p9 = por %p165_p6, %p49_p1  ;;  %p618_p13 = scmp.lt.s32.totalorder %s791_s23, 2 }
   0xf   : > { %s887_s7 = scalar_select %p40_p7, %s779_s20, %s42_s27  }
  0x10   : > { %s1031_s6 = scalar_select %p882_p9, 1, 0 }
  0x11   : > { %p889_p11 = por %p171_p10, %p55_p3  ;;  %s203_s9 = sand.u32 1, %s779_s20  }
  0x12   : > { %s579_s10 = sshll.u32 %s203_s9, 5  ;;  %s600_s11 = sshll.u32 %s787_s22, 9 }
  0x13   : > { %s1032_s8 = scalar_select %p889_p11, 1, 0 }
  0x14   : > { %s900_s14 = scalar_lea.hbm %s1022_s0, %s600_s11  ;;  %s207_s15 = scalar_lea.vmem [#allocation2], %s579_s10 }
  0x15   : > { %s216_s16 = sshll.u32 %s207_s15, 4  ;;  %p906_p0 = pnand %p618_p13, %p872_p4  ;;  %s902_s16 = int_to_ptr.vmem [resolvable:$true] %s216_s16 }
  0x16   : > { %s911_s24 = scalar_lea.sflag [#allocation3], %s203_s9  ;;  %s679_s25 = scalar_lea.hbm %s900_s14, 512 }
  0x17   : > { %p680_p2 = scmp.ne.s32.totalorder %s900_s14, %s679_s25  ;;  %p681_p3 = pneg %p906_p0 }
  0x18   : > { %s684_s28 = scalar_lea.hbm %s1022_s0, 1024  ;;  %p685_p4 = scmp.lt.u32.totalorder %s900_s14, %s1022_s0 }
  0x19   : > { %p682_p5 = pnand %p681_p3, %p680_p2  ;;  %p686_p7 = scmp.lt.u32.totalorder %s684_s28, %s679_s25 }
  0x1a   : > { %p688_p13 = scmp.lt.u32.totalorder %s679_s25, %s900_s14 }
  0x1b   : > { %p683_p6 = pneg %p682_p5  ;;  %p687_p10 = por %p686_p7, %p685_p4 }
  0x1d   : > { %p689_p12 = por %p688_p13, %p687_p10 }
  0x1f   : > { %p690_p1 = pnand %p689_p12, %p683_p6 }
  0x21   : > { %693 = shalt.err (!%p690_p1)
}
  0x22   : > { %s694_s9 = scalar_lea.vmem %s902_s16, 512  ;;  %s793_s12 = smov [#allocation2]  }
  0x23   : > { %p695_p2 = scmp.ne.s32.totalorder %s902_s16, %s694_s9  ;;  %s699_s13 = sshll.u32 %s793_s12, 4  ;;  %s700_s13 = int_to_ptr.vmem [resolvable:$false] %s699_s13 }
  0x24   : > { %s701_s15 = scalar_lea.vmem %s700_s13, 1024  ;;  %p702_p9 = scmp.lt.s32.totalorder %s902_s16, %s700_s13 }
  0x25   : > { %p697_p5 = pnand %p695_p2, %p681_p3  ;;  %p703_p4 = scmp.lt.s32.totalorder %s701_s15, %s694_s9 }
  0x27   : > { %p698_p11 = pneg %p697_p5  ;;  %p704_p7 = por %p703_p4, %p702_p9 }
  0x29   : > { %p705_p10 = pnand %p704_p7, %p698_p11 }
  0x2b   : > { %708 = shalt.err (!%p705_p10)
}
  0x2c   : > { %s794_s25 = smov 128   ;;  %s795_s27 = smov 8  }
  0x2d   : > { %613 = dma.hbm_to_vmem [thread:$0]  (!%p906_p0), %s900_s14, 512, %s902_s16, %s911_s24, %s794_s25, %s794_s25, %s795_s27  }
  0x2e   : > { %p224_p12 = scmp.lt.s32.totalorder %s791_s23, 3  ;;  %p1034_p1 = scmp.ge.s32.totalorder %s791_s23, 1 }
  0x30   : > { %p225_p3 = pnand %p1034_p1, %p224_p12 }
  0x31   : > { %s943_s29 = sand.u32 (!%p225_p3), 1, %s775_s19  }
  0x32   : > { %228 = sbr.rel (%p225_p3) target bundleno = 523 (0x20b), region = 40  ;;  %s583_s28 = sshll.u32 (!%p225_p3), %s943_s29, 5 }
  0x33   : > { %s231_s10 = scalar_lea.sflag (!%p225_p3), [#allocation3], %s943_s29  ;;  %s234_s11 = scalar_lea.vmem (!%p225_p3), [#allocation2], %s583_s28 }
  0x39   : > { %762 = dma.done.wait (%p878_p8), %s231_s10, 512  }
  0x3a   : > { %764 = vsyncadd (%p878_p8), %s231_s10, 4294966784  ;;  %v796_v0 = vmov 0   ;;  %v265_v1 = vld [vmem:[%s234_s11] sm:$0xff]  ;;  %v266_v2 = vld [vmem:[%s234_s11 + $0x8] sm:$0xff]  ;;  %vm295_vm0 = vcmask 261120   ;;  %v797_v12 = vmov 0.0  }
  0x3b   : > { %331 = vmatprep.mubr.bf16.mxu0 %v796_v0  ;;  %674 = vset.pattern.permute.xlu0 %v796_v0  ;;  %v267_v3 = vld [vmem:[%s234_s11 + $0x10] sm:$0xff]  ;;  %v586_v4 = vcombine.high %v265_v1, %v266_v2  ;;  %v585_v5 = vcombine.low %v265_v1, %v266_v2  ;;  %v268_v6 = vld [vmem:[%s234_s11 + $0x18] sm:$0xff]  ;;  %v269_v7 = vld [vmem:[%s1024_s2] sm:$0xff]  ;;  %vm349_vm1 = vcmask 64512   ;;  %v426_v23 = vunpack.c.l.bf16 %v265_v1  ;;  %s605_s15 = sshll.u32 %s783_s21, 9  ;;  %s260_s25 = scalar_lea.vmem [#allocation5], %s583_s28 }
  0x3c   : > { %v588_v8 = vcombine.high %v267_v3, %v268_v6  ;;  %272 = vperm.xlu0 %674, %v269_v7   ;;  %v343_v9 = vld [vmem:[%s1026_s4] sm:$0xff]  ;;  %v587_v10 = vcombine.low %v267_v3, %v268_v6  ;;  %417 = vmatprep.mubr.f32.mxu1 %v797_v12  ;;  %v428_v24 = vunpack.c.l.bf16 %v266_v2  ;;  %v450_v25 = vunpack.c.l.bf16 %v267_v3  ;;  %s488_s27 = sshll.u32 %s260_s25, 4  ;;  %s971_s14 = scalar_lea.hbm %s1027_s5, %s605_s15  ;;  %s973_s27 = int_to_ptr.vmem [resolvable:$true] %s488_s27 }
  0x3d   : > { %299 = vmatprep.subr.bf16.mxu0 %v586_v4  ;;  %v264_v11 = vld [vmem:[%s1023_s1] sm:$0xf]  ;;  %v452_v26 = vunpack.c.l.bf16 %v268_v6  ;;  %v427_v29 = vunpack.c.h.bf16 %v265_v1  ;;  %v429_v30 = vunpack.c.h.bf16 %v266_v2  ;;  %v451_v31 = vunpack.c.h.bf16 %v267_v3  ;;  %s473_s21 = scalar_lea.sflag [#allocation4], %s943_s29  ;;  %s709_s28 = scalar_lea.vmem %s973_s27, 512 }
  0x3e   : > { %300 = vmatpush1.bf16.msra.mxu0 %v585_v5  ;;  %v342_v22 = vld [vmem:[%s1025_s3] sm:$0xff]  ;;  %v453_v32 = vunpack.c.h.bf16 %v268_v6  ;;  %p710_p8 = scmp.ne.s32.totalorder %s973_s27, %s709_s28  ;;  %p1035_p9 = scmp.ne.s32.totalorder %s1031_s6, 0 }
  0x3f   : > { %301 = vmatprep.subr.bf16.mxu0 %v588_v8  ;;  %s798_s16 = smov [#allocation5]  }
  0x40   : > { %346 = vperm.xlu0 %674, %v343_v9   ;;  %p711_p11 = pnand %p710_p8, %p1035_p9  ;;  %s713_s17 = sshll.u32 %s798_s16, 4  ;;  %s714_s17 = int_to_ptr.vmem [resolvable:$false] %s713_s17 }
  0x41   : > { %s715_s24 = scalar_lea.vmem %s714_s17, 1024  ;;  %p716_p6 = scmp.lt.s32.totalorder %s973_s27, %s714_s17 }
  0x42   : > { %302 = vmatpush1.bf16.msra.mxu0 %v587_v10  ;;  %p712_p0 = pneg %p711_p11  ;;  %p717_p13 = scmp.lt.s32.totalorder %s715_s24, %s709_s28 }
  0x44   : > { %p718_p2 = por %p717_p13, %p716_p6 }
  0x45   : > { %589 = vmatmul.mubr.msk.bf16.vlgmr.msra.gmra.mrb[0].mxu0 %vm295_vm0, %v264_v11 }
  0x46   : > { %p719_p5 = pnand %p718_p2, %p712_p0 }
  0xbb   : > { %v273_v13 = vpop.permute.xlu0 %272 }
  0xbf   : > { %v347_v27 = vpop.permute.xlu0 %346 }
 0x118   : > { %v333_v14 = vpop.f32.mrb[0].mxu0 }
 0x119   : > { %v334_v15 = vadd.f32 %v333_v14, %v273_v13  ;;  %v335_v16 = vpop.f32.mrb[1].mxu0 }
 0x11a   : > { %v337_v17 = vpop.f32.mrb[2].mxu0  ;;  %v336_v18 = vadd.f32 %v335_v16, %v273_v13 }
 0x11b   : > { %v338_v19 = vpop.f32.mrb[3].mxu0  ;;  %v340_v21 = vmax.f32 %v334_v15, 0.0 }
 0x11c   : > { %v341_v20 = vmax.f32 %v336_v18, 0.0 }
 0x11e   : > { %353 = vmatprep.subr.mxu1 %v341_v20 }
 0x11f   : > { %354 = vmatpush1.msra.mxu1 %v340_v21 }
 0x120   : > { %590 = vmatmul.mubr.msk.f32.vlgmr.msra.gmra.mrb[0].mxu1 %vm349_vm1, %v342_v22 }
 0x1f3   : > { %v419_v28 = vpop.f32.mrb[0].mxu1 }
 0x1f4   : > { %v420_v33 = vadd.f32 %v419_v28, %v347_v27  ;;  %v421_v34 = vpop.f32.mrb[1].mxu1 }
 0x1f5   : > { %v422_v35 = vadd.f32 %v421_v34, %v347_v27 }
 0x1f6   : > { %v430_v36 = vadd.f32 %v426_v23, %v420_v33  ;;  %v432_v37 = vadd.f32 %v428_v24, %v420_v33  ;;  %v454_v38 = vadd.f32 %v450_v25, %v420_v33  ;;  %v456_v39 = vadd.f32 %v452_v26, %v420_v33 }
 0x1f7   : > { %v431_v40 = vadd.f32 %v427_v29, %v422_v35  ;;  %v433_v41 = vadd.f32 %v429_v30, %v422_v35  ;;  %v455_v42 = vadd.f32 %v451_v31, %v422_v35  ;;  %v457_v43 = vadd.f32 %v453_v32, %v422_v35 }
 0x1f9   : > { %v601_v44 = vpack.c.bf16 %v431_v40, %v430_v36  ;;  %v602_v45 = vpack.c.bf16 %v433_v41, %v432_v37  ;;  %v603_v46 = vpack.c.bf16 %v455_v42, %v454_v38  ;;  %v604_v47 = vpack.c.bf16 %v457_v43, %v456_v39 }
 0x1fb   : > { %446 = vst [vmem:[%s260_s25] sm:$0xff] %v601_v44  ;;  %447 = vst [vmem:[%s260_s25 + $0x8] sm:$0xff] %v602_v45 }
 0x1fc   : > { %470 = vst [vmem:[%s260_s25 + $0x10] sm:$0xff] %v603_v46  ;;  %471 = vst [vmem:[%s260_s25 + $0x18] sm:$0xff] %v604_v47 }
 0x1fd   : > { %722 = shalt.err (!%p719_p5)
}
 0x1fe   : > { %s723_s30 = scalar_lea.hbm %s971_s14, 512  ;;  %s727_s13 = scalar_lea.hbm %s1027_s5, 1024 }
 0x1ff   : > { %p724_p4 = scmp.ne.s32.totalorder %s971_s14, %s723_s30  ;;  %p728_p12 = scmp.lt.u32.totalorder %s971_s14, %s1027_s5 }
 0x200   : > { %p729_p1 = scmp.lt.u32.totalorder %s727_s13, %s723_s30  ;;  %p731_p8 = scmp.lt.u32.totalorder %s723_s30, %s971_s14 }
 0x201   : > { %p725_p7 = pnand %p724_p4, %p1035_p9 }
 0x202   : > { %p730_p3 = por %p729_p1, %p728_p12 }
 0x203   : > { %p726_p10 = pneg %p725_p7 }
 0x204   : > { %p732_p11 = por %p731_p8, %p730_p3 }
 0x206   : > { %p733_p0 = pnand %p732_p11, %p726_p10 }
 0x208   : > { %736 = shalt.err (!%p733_p0)
}
 0x209   : > { %s799_s10 = smov 128   ;;  %s800_s11 = smov 8  }
 0x20a   : > { %608 = dma.vmem_to_hbm [thread:$0]  (%p1035_p9), %s973_s27, 512, %s971_s14, %s473_s21, %s799_s10, %s799_s10, %s800_s11  }
 0x20b PF: > { %s503_s28 = sand.u32 1, %s771_s18   ;;  %p1036_p6 = scmp.ne.s32.totalorder %s1032_s8, 0 }
 0x20c   : > { %p1037_p13 = scmp.ge.s32.totalorder %s791_s23, 2  ;;  %s504_s16 = scalar_lea.sflag [#allocation4], %s503_s28 }
 0x20e   : > { %p615_p2 = pnand %p1037_p13, %p1036_p6 }
 0x210   : > { %766 = dma.done.wait (!%p615_p2), %s504_s16, 512  }
 0x211   : > { %768 = vsyncadd (!%p615_p2), %s504_s16, 4294966784  ;;  %s21_s23 = sadd.s32 1, %s791_s23   ;;  %s1038_s18 = smov %s775_s19 }
 0x212   : > { %p18_p5 = scmp.ge.s32.totalorder %s21_s23, 4   ;;  %s1039_s19 = smov %s779_s20 }
 0x213   : > { %s1040_s20 = smov %s887_s7  ;;  %s1041_s21 = smov %s787_s22 }
 0x214   : > { %s1042_s22 = smov %s1044_s26  ;;  %20 = sbr.rel (!%p18_p5) target bundleno = 6 (0x6), region = 85 }
 0x21b   :  { %509 = vsyncpa [#allocation3], 1 }
 0x21c   :  { %511 = vsyncpa [#allocation3 + $0x1], 1 }
 0x21d   :  { %512 = vsyncpa [#allocation4], 1 }
 0x21e   :  { %514 = vsyncpa [#allocation4 + $0x1], 1 }

</bundles_post_ra>
